<compile_context>
chip_gen: v5e
topology: v5e:2x2
jax: 0.10.0
libtpu: 0.0.40
codegen_flags: <defaults>
</compile_context>

<pallas_src>
import functools

import jax
import jax.numpy as jnp
from jax.experimental import pallas as pl
from jax.experimental.pallas import tpu as pltpu


LANE = 128     # feature (lane) dims padded to multiples of this
SUBLANE = 8    # base sublane granularity for 4-byte tiles


def _round_up(n, m):
    return ((n + m - 1) // m) * m


def _sublane_multiple(dtype):
    """Sublane-packing granularity for a tile of the given dtype."""
    itemsize = jnp.dtype(dtype).itemsize
    return SUBLANE * max(1, 4 // itemsize)


def _device_defaults():
    """(default block_m, per-core VMEM capacity bytes) for the local TPU."""
    try:
        kind = jax.devices()[0].device_kind.lower()
    except Exception:
        kind = ""
    block_m = 128 if "v5" in kind else 256   # v5e MXU is 128-wide; v6e/v7x 256
    try:
        vmem_cap = int(pltpu.get_tpu_info().vmem_capacity_bytes)
    except Exception:
        vmem_cap = 64 << 20                  # conservative (v7x per-TC VMEM)
    return block_m, vmem_cap


# ----------------------------- kernels --------------------------------------


def _resblock_kernel_fused_skip(
    x_ref, w1s_ref, b1s_ref, w2_ref, b2_ref, w3_ref, b3_ref, o_ref, *, hid_p
):
    """layer1 and the skip projection fused into one wide matmul over x."""
    xc = x_ref[...].astype(w1s_ref.dtype)
    hs = jnp.dot(xc, w1s_ref[...], preferred_element_type=jnp.float32) + b1s_ref[...]
    h = hs[:, :hid_p]          # layer1 output (f32)
    r = hs[:, hid_p:]          # skip projection (f32)
    h = jnp.dot(h.astype(w2_ref.dtype), w2_ref[...],
                preferred_element_type=jnp.float32) + b2_ref[...]
    h = jnp.dot(h.astype(w3_ref.dtype), w3_ref[...],
                preferred_element_type=jnp.float32) + b3_ref[...]
    o_ref[...] = (h + r).astype(o_ref.dtype)


def _resblock_kernel_identity_skip(
    x_ref, w1_ref, b1_ref, w2_ref, b2_ref, w3_ref, b3_ref, o_ref
):
    x = x_ref[...]                              # original precision residual
    h = jnp.dot(x.astype(w1_ref.dtype), w1_ref[...],
                preferred_element_type=jnp.float32) + b1_ref[...]
    h = jnp.dot(h.astype(w2_ref.dtype), w2_ref[...],
                preferred_element_type=jnp.float32) + b2_ref[...]
    h = jnp.dot(h.astype(w3_ref.dtype), w3_ref[...],
                preferred_element_type=jnp.float32) + b3_ref[...]
    o_ref[...] = (h + x.astype(jnp.float32)).astype(o_ref.dtype)


# ---------------------- parameter preparation (hoisted) ----------------------


def prepare_resblock_params(params, *, compute_dtype=jnp.bfloat16):
    """Pad / cast / fuse the weights ONCE so the forward path does no HBM
    rewriting.  Returns a dict reusable across calls."""
    if isinstance(params, dict) and params.get("_prepared", False):
        return params

    cdt = jnp.dtype(compute_dtype)
    in_f, hid = params["w1"].shape
    out_f = params["w3"].shape[1]
    has_skip = "ws" in params
    if not has_skip:
        assert in_f == out_f, "identity skip requires in_features == out_features"

    in_p = _round_up(in_f, LANE)
    hid_p = _round_up(hid, LANE)
    out_p = _round_up(out_f, LANE)

    def pad2(a, rows, cols):
        return jnp.pad(a, ((0, rows - a.shape[0]), (0, cols - a.shape[1])))

    w1 = pad2(params["w1"], in_p, hid_p).astype(cdt)
    b1 = pad2(params["b1"], 1, hid_p).astype(jnp.float32)
    w2 = pad2(params["w2"], hid_p, hid_p).astype(cdt)
    b2 = pad2(params["b2"], 1, hid_p).astype(jnp.float32)
    w3 = pad2(params["w3"], hid_p, out_p).astype(cdt)
    b3 = pad2(params["b3"], 1, out_p).astype(jnp.float32)

    prepared = dict(
        _prepared=True, in_f=in_f, out_f=out_f, hid=hid,
        in_p=in_p, hid_p=hid_p, out_p=out_p,
        has_skip=has_skip, compute_dtype=cdt,
        w2=w2, b2=b2, w3=w3, b3=b3,
    )
    if has_skip:
        ws = pad2(params["ws"], in_p, out_p).astype(cdt)
        bs = pad2(params["bs"], 1, out_p).astype(jnp.float32)
        # Fuse layer1 with the skip projection: one (in_p, hid_p+out_p) matmul.
        prepared["w1s"] = jnp.concatenate([w1, ws], axis=1)
        prepared["b1s"] = jnp.concatenate([b1, bs], axis=1)
    else:
        prepared["w1"] = w1
        prepared["b1"] = b1

    for v in prepared.values():            # materialize now, not at first call
        if isinstance(v, jax.Array):
            v.block_until_ready()
    return prepared


# ----------------------------- wrapper ---------------------------------------


def resblock_forward(x, params, *, block_m=None, compute_dtype=None):
    """Pallas ResBlock forward.

    x:       [B, in_features]
    params:  raw dict ('w1','b1',...,'ws','bs') or the output of
             prepare_resblock_params (preferred: prepare once, reuse).
    block_m: batch tile for large batches.  Defaults to 256 on v6e/v7x,
             128 on v5e.
    compute_dtype: MXU dtype for weights/activations (default bfloat16,
             f32 accumulation).  Ignored if params are already prepared.
    """
    if not (isinstance(params, dict) and params.get("_prepared", False)):
        params = prepare_resblock_params(
            params,
            compute_dtype=(jnp.bfloat16 if compute_dtype is None else compute_dtype),
        )
    p = params

    B, in_f = x.shape
    assert in_f == p["in_f"]
    out_f = p["out_f"]
    in_p, hid_p, out_p = p["in_p"], p["hid_p"], p["out_p"]
    has_skip = p["has_skip"]
    out_dtype = x.dtype

    default_bm, vmem_cap = _device_defaults()
    if block_m is None:
        block_m = default_bm

    # ---- batch padding / tile choice ----------------------------------------
    sub = _sublane_multiple(x.dtype)
    if B <= block_m:
        if B > 128:
            # Keep >=2 grid steps so the "parallel" axis can shard across the
            # two TensorCores on v7x (harmless single extra step elsewhere).
            bm = _round_up((B + 1) // 2, sub)
        else:
            bm = _round_up(B, sub)        # whole batch in one tile
    else:
        bm = block_m
    B_pad = _round_up(B, bm)
    grid = (B_pad // bm,)

    # x stays in its ORIGINAL dtype: the identity residual keeps full
    # precision; the kernel casts to the compute dtype only for the matmul.
    x_p = jnp.pad(x, ((0, B_pad - B), (0, in_p - in_f)))

    x_spec = pl.BlockSpec((bm, in_p), lambda i: (i, 0))
    o_spec = pl.BlockSpec((bm, out_p), lambda i: (i, 0))

    def _build_and_call(weight_pipeline_mode):
        def _resident(shape):
            # Grid-invariant operands (weights/biases): whole-array block with
            # a constant index map -> DMA'd once, resident in VMEM.  With
            # Buffered(1) they are single-buffered (half the VMEM footprint).
            kwargs = {}
            if weight_pipeline_mode is not None:
                kwargs["pipeline_mode"] = weight_pipeline_mode
            return pl.BlockSpec(shape, lambda i: (0,) * len(shape), **kwargs)

        if has_skip:
            kernel = functools.partial(_resblock_kernel_fused_skip, hid_p=hid_p)
            in_specs = [
                x_spec,
                _resident((in_p, hid_p + out_p)),
                _resident((1, hid_p + out_p)),
                _resident((hid_p, hid_p)),
                _resident((1, hid_p)),
                _resident((hid_p, out_p)),
                _resident((1, out_p)),
            ]
            args = [x_p, p["w1s"], p["b1s"], p["w2"], p["b2"], p["w3"], p["b3"]]
        else:
            kernel = _resblock_kernel_identity_skip
            in_specs = [
                x_spec,
                _resident((in_p, hid_p)),
                _resident((1, hid_p)),
                _resident((hid_p, hid_p)),
                _resident((1, hid_p)),
                _resident((hid_p, out_p)),
                _resident((1, out_p)),
            ]
            args = [x_p, p["w1"], p["b1"], p["w2"], p["b2"], p["w3"], p["b3"]]

        # ---- VMEM budget derived from the actual resident buffers ----------
        weight_bytes = sum(int(a.size) * a.dtype.itemsize for a in args[1:])
        n_weight_bufs = 1 if weight_pipeline_mode is not None else 2
        x_tile_bytes = bm * in_p * x_p.dtype.itemsize
        o_tile_bytes = bm * out_p * jnp.dtype(out_dtype).itemsize
        interm_bytes = 4 * bm * (hid_p + out_p) * 4      # f32 intermediates
        vmem_need = (n_weight_bufs * weight_bytes
                     + 2 * (x_tile_bytes + o_tile_bytes)
                     + interm_bytes)
        vmem_limit = int(min(max(int(1.5 * vmem_need), 16 << 20),
                             max(vmem_cap - (4 << 20), 16 << 20)))
        # TODO(synk): when n_weight_bufs * weight_bytes exceeds ~0.6*vmem_cap
        # (very large hidden sizes, esp. v7x 64 MiB per-TC), stream the
        # weights over a hid_p grid axis ("arbitrary" + VMEM accumulator)
        # instead of relying on whole-weight residency.

        flops = 2 * B_pad * hid_p * (in_p + hid_p + out_p)
        if has_skip:
            flops += 2 * B_pad * in_p * out_p
        bytes_accessed = (weight_bytes
                          + x_p.size * x_p.dtype.itemsize
                          + B_pad * out_p * jnp.dtype(out_dtype).itemsize)

        return pl.pallas_call(
            kernel,
            out_shape=jax.ShapeDtypeStruct((B_pad, out_p), out_dtype),
            grid_spec=pltpu.PrefetchScalarGridSpec(
                num_scalar_prefetch=0,
                grid=grid,
                in_specs=in_specs,
                out_specs=o_spec,
            ),
            compiler_params=pltpu.CompilerParams(
                dimension_semantics=("parallel",),
                vmem_limit_bytes=vmem_limit,
            ),
            cost_estimate=pl.CostEstimate(
                flops=flops, transcendentals=0, bytes_accessed=bytes_accessed
            ),
        )(*args)

    try:
        y_pad = _build_and_call(pl.Buffered(1))
    except Exception:
        # Fallback for environments where pipeline_mode=Buffered(1) is not
        # supported: let Pallas default-double-buffer the resident weights.
        y_pad = _build_and_call(None)

    # Strip batch + feature padding.
    return y_pad[:B, :out_f]


# ------------------------- parameter construction ----------------------------


def init_resblock_params(key, in_features, out_features, hidden_features):
    """Deterministic synthetic init (PyTorch-style uniform bounds)."""

    def linear(key, fan_in, fan_out):
        kw, kb = jax.random.split(key)
        bound = 1.0 / jnp.sqrt(jnp.float32(fan_in))
        w = jax.random.uniform(kw, (fan_in, fan_out), jnp.float32, -bound, bound)
        b = jax.random.uniform(kb, (1, fan_out), jnp.float32, -bound, bound)
        return w, b

    k1, k2, k3, ks = jax.random.split(key, 4)
    p = {}
    p["w1"], p["b1"] = linear(k1, in_features, hidden_features)
    p["w2"], p["b2"] = linear(k2, hidden_features, hidden_features)
    p["w3"], p["b3"] = linear(k3, hidden_features, out_features)
    if in_features != out_features:
        p["ws"], p["bs"] = linear(ks, in_features, out_features)
    return p


def resblock_reference(x, params):
    h = x @ params["w1"] + params["b1"]
    h = h @ params["w2"] + params["b2"]
    h = h @ params["w3"] + params["b3"]
    if "ws" in params:
        r = x @ params["ws"] + params["bs"]
    else:
        r = x
    return h + r


# --------------------------------- main ---------------------------------------

if __name__ == "__main__":
    key = jax.random.PRNGKey(0)
    kx, kp1, kp2 = jax.random.split(key, 3)

    # Case 1: in_features != out_features -> skip is a Linear layer (fused),
    # f32 compute for a tight numerical check.
    B, in_f, hid, out_f = 16, 32, 64, 48
    params = init_resblock_params(kp1, in_f, out_f, hid)
    prep_f32 = prepare_resblock_params(params, compute_dtype=jnp.float32)
    x = jax.random.normal(kx, (B, in_f), jnp.float32)
    y = jax.block_until_ready(resblock_forward(x, prep_f32))
    y_ref = resblock_reference(x, params)
    assert y.shape == y_ref.shape
    assert jnp.allclose(y, y_ref, atol=1e-5, rtol=1e-5), "mismatch (linear skip)"

    # Case 2: in_features == out_features -> skip is Identity (f32 compute;
    # residual stays in the original x precision).
    in_f2 = out_f2 = 32
    hid2 = 64
    params2 = init_resblock_params(kp2, in_f2, out_f2, hid2)
    prep2_f32 = prepare_resblock_params(params2, compute_dtype=jnp.float32)
    x2 = jax.random.normal(kx, (B, in_f2), jnp.float32)
    y2 = jax.block_until_ready(resblock_forward(x2, prep2_f32))
    y2_ref = resblock_reference(x2, params2)
    assert jnp.allclose(y2, y2_ref, atol=1e-5, rtol=1e-5), "mismatch (identity skip)"

    # Case 3: ragged batch, explicit small block_m -> multi-step grid, with the
    # default bf16 compute dtype (f32 accumulation) and cached prepared params.
    prep_bf16 = prepare_resblock_params(params)          # default bf16, reused below
    B3 = 40                                              # pads to 48 -> 3 grid steps
    x3 = jax.random.normal(kx, (B3, in_f), jnp.float32)
    y3 = jax.block_until_ready(resblock_forward(x3, prep_bf16, block_m=16))
    y3_ref = resblock_reference(x3, params)
    assert y3.shape == y3_ref.shape
    assert jnp.allclose(y3, y3_ref, atol=1e-1, rtol=1e-1), "mismatch (bf16 ragged)"

    # Case 4: B > 128 -> the wrapper guarantees >=2 grid steps (megacore split
    # on v7x); reuses the same cached bf16 params.
    B4 = 144
    x4 = jax.random.normal(kx, (B4, in_f), jnp.float32)
    y4 = jax.block_until_ready(resblock_forward(x4, prep_bf16))
    y4_ref = resblock_reference(x4, params)
    assert y4.shape == y4_ref.shape
    assert jnp.allclose(y4, y4_ref, atol=1e-1, rtol=1e-1), "mismatch (bf16 B>128)"

    print("KERNEL_OK")
</pallas_src>

<mosaic_0001>
module attributes {stable_mosaic.version = 11 : i64} {
  func.func @_resblock_kernel_fused_skip(%arg0: i32, %arg1: memref<16x128xf32, #tpu.memory_space<vmem>>, %arg2: memref<128x256xf32, #tpu.memory_space<vmem>>, %arg3: memref<1x256xf32, #tpu.memory_space<vmem>>, %arg4: memref<128x128xf32, #tpu.memory_space<vmem>>, %arg5: memref<1x128xf32, #tpu.memory_space<vmem>>, %arg6: memref<128x128xf32, #tpu.memory_space<vmem>>, %arg7: memref<1x128xf32, #tpu.memory_space<vmem>>, %arg8: memref<16x128xf32, #tpu.memory_space<vmem>>) attributes {dimension_semantics = [#tpu.dimension_semantics<parallel>], iteration_bounds = array<i64: 1>, scalar_prefetch = 0 : i64, scratch_operands = 0 : i64, tpu.core_type = #tpu.core_type<tc>, window_params = [{transform_indices = @transform_0, window_bounds = array<i64: 16, 128>}, {pipeline_mode = #tpu.pipeline_mode<synchronous>, transform_indices = @transform_1, window_bounds = array<i64: 128, 256>}, {pipeline_mode = #tpu.pipeline_mode<synchronous>, transform_indices = @transform_2, window_bounds = array<i64: 1, 256>}, {pipeline_mode = #tpu.pipeline_mode<synchronous>, transform_indices = @transform_3, window_bounds = array<i64: 128, 128>}, {pipeline_mode = #tpu.pipeline_mode<synchronous>, transform_indices = @transform_4, window_bounds = array<i64: 1, 128>}, {pipeline_mode = #tpu.pipeline_mode<synchronous>, transform_indices = @transform_5, window_bounds = array<i64: 128, 128>}, {pipeline_mode = #tpu.pipeline_mode<synchronous>, transform_indices = @transform_6, window_bounds = array<i64: 1, 128>}, {transform_indices = @transform_7, window_bounds = array<i64: 16, 128>}]} {
    %c0 = arith.constant 0 : index
    %c0_0 = arith.constant 0 : index
    %0 = vector.load %arg1[%c0, %c0_0] : memref<16x128xf32, #tpu.memory_space<vmem>>, vector<16x128xf32>
    %c0_1 = arith.constant 0 : index
    %c0_2 = arith.constant 0 : index
    %1 = vector.load %arg2[%c0_1, %c0_2] : memref<128x256xf32, #tpu.memory_space<vmem>>, vector<128x256xf32>
    %cst = arith.constant dense<0.000000e+00> : vector<16x256xf32>
    %2 = tpu.matmul %0, %1, %cst {dimension_numbers = #tpu.dot_dimension_numbers<[1], [0], [0], [1], [0, 0, 1, 1], [], []>} : vector<16x128xf32>, vector<128x256xf32>, vector<16x256xf32> -> vector<16x256xf32>
    %c0_3 = arith.constant 0 : index
    %c0_4 = arith.constant 0 : index
    %3 = vector.load %arg3[%c0_3, %c0_4] : memref<1x256xf32, #tpu.memory_space<vmem>>, vector<1x256xf32>
    %4 = vector.broadcast %3 : vector<1x256xf32> to vector<16x256xf32>
    %5 = arith.addf %2, %4 : vector<16x256xf32>
    %6 = vector.extract_strided_slice %5 {offsets = [0, 0], sizes = [16, 128], strides = [1, 1]} : vector<16x256xf32> to vector<16x128xf32>
    %7 = vector.extract_strided_slice %5 {offsets = [0, 128], sizes = [16, 128], strides = [1, 1]} : vector<16x256xf32> to vector<16x128xf32>
    %c0_5 = arith.constant 0 : index
    %c0_6 = arith.constant 0 : index
    %8 = vector.load %arg4[%c0_5, %c0_6] : memref<128x128xf32, #tpu.memory_space<vmem>>, vector<128x128xf32>
    %cst_7 = arith.constant dense<0.000000e+00> : vector<16x128xf32>
    %9 = tpu.matmul %6, %8, %cst_7 {dimension_numbers = #tpu.dot_dimension_numbers<[1], [0], [0], [1], [0, 0, 1, 1], [], []>} : vector<16x128xf32>, vector<128x128xf32>, vector<16x128xf32> -> vector<16x128xf32>
    %c0_8 = arith.constant 0 : index
    %c0_9 = arith.constant 0 : index
    %10 = vector.load %arg5[%c0_8, %c0_9] : memref<1x128xf32, #tpu.memory_space<vmem>>, vector<1x128xf32>
    %11 = vector.broadcast %10 : vector<1x128xf32> to vector<16x128xf32>
    %12 = arith.addf %9, %11 : vector<16x128xf32>
    %c0_10 = arith.constant 0 : index
    %c0_11 = arith.constant 0 : index
    %13 = vector.load %arg6[%c0_10, %c0_11] : memref<128x128xf32, #tpu.memory_space<vmem>>, vector<128x128xf32>
    %cst_12 = arith.constant dense<0.000000e+00> : vector<16x128xf32>
    %14 = tpu.matmul %12, %13, %cst_12 {dimension_numbers = #tpu.dot_dimension_numbers<[1], [0], [0], [1], [0, 0, 1, 1], [], []>} : vector<16x128xf32>, vector<128x128xf32>, vector<16x128xf32> -> vector<16x128xf32>
    %c0_13 = arith.constant 0 : index
    %c0_14 = arith.constant 0 : index
    %15 = vector.load %arg7[%c0_13, %c0_14] : memref<1x128xf32, #tpu.memory_space<vmem>>, vector<1x128xf32>
    %16 = vector.broadcast %15 : vector<1x128xf32> to vector<16x128xf32>
    %17 = arith.addf %14, %16 : vector<16x128xf32>
    %18 = arith.addf %17, %7 : vector<16x128xf32>
    %c0_15 = arith.constant 0 : index
    %c0_16 = arith.constant 0 : index
    %19 = vector.load %arg8[%c0_15, %c0_16] : memref<16x128xf32, #tpu.memory_space<vmem>>, vector<16x128xf32>
    tpu.vector_store %arg8[%c0_15, %c0_16], %18 {strides = array<i32>} : memref<16x128xf32, #tpu.memory_space<vmem>>, vector<16x128xf32>,
    return
  }
  func.func @transform_0(%arg0: i32) -> (i32, i32) {
    %c0_i32 = arith.constant 0 : i32
    %c0_i32_0 = arith.constant 0 : i32
    return %arg0, %c0_i32 : i32, i32
  }
  func.func @transform_1(%arg0: i32) -> (i32, i32) {
    %c0_i32 = arith.constant 0 : i32
    %c0_i32_0 = arith.constant 0 : i32
    %c0_i32_1 = arith.constant 0 : i32
    return %c0_i32, %c0_i32_0 : i32, i32
  }
  func.func @transform_2(%arg0: i32) -> (i32, i32) {
    %c0_i32 = arith.constant 0 : i32
    %c0_i32_0 = arith.constant 0 : i32
    %c0_i32_1 = arith.constant 0 : i32
    return %c0_i32, %c0_i32_0 : i32, i32
  }
  func.func @transform_3(%arg0: i32) -> (i32, i32) {
    %c0_i32 = arith.constant 0 : i32
    %c0_i32_0 = arith.constant 0 : i32
    %c0_i32_1 = arith.constant 0 : i32
    return %c0_i32, %c0_i32_0 : i32, i32
  }
  func.func @transform_4(%arg0: i32) -> (i32, i32) {
    %c0_i32 = arith.constant 0 : i32
    %c0_i32_0 = arith.constant 0 : i32
    %c0_i32_1 = arith.constant 0 : i32
    return %c0_i32, %c0_i32_0 : i32, i32
  }
  func.func @transform_5(%arg0: i32) -> (i32, i32) {
    %c0_i32 = arith.constant 0 : i32
    %c0_i32_0 = arith.constant 0 : i32
    %c0_i32_1 = arith.constant 0 : i32
    return %c0_i32, %c0_i32_0 : i32, i32
  }
  func.func @transform_6(%arg0: i32) -> (i32, i32) {
    %c0_i32 = arith.constant 0 : i32
    %c0_i32_0 = arith.constant 0 : i32
    %c0_i32_1 = arith.constant 0 : i32
    return %c0_i32, %c0_i32_0 : i32, i32
  }
  func.func @transform_7(%arg0: i32) -> (i32, i32) {
    %c0_i32 = arith.constant 0 : i32
    %c0_i32_0 = arith.constant 0 : i32
    return %arg0, %c0_i32 : i32, i32
  }
}

module attributes {stable_mosaic.version = 11 : i64} {
  func.func @_resblock_kernel_fused_skip(%arg0: i32, %arg1: memref<16x128xf32, #tpu.memory_space<vmem>>, %arg2: memref<128x256xf32, #tpu.memory_space<vmem>>, %arg3: memref<1x256xf32, #tpu.memory_space<vmem>>, %arg4: memref<128x128xf32, #tpu.memory_space<vmem>>, %arg5: memref<1x128xf32, #tpu.memory_space<vmem>>, %arg6: memref<128x128xf32, #tpu.memory_space<vmem>>, %arg7: memref<1x128xf32, #tpu.memory_space<vmem>>, %arg8: memref<16x128xf32, #tpu.memory_space<vmem>>) attributes {dimension_semantics = [#tpu.dimension_semantics<parallel>], iteration_bounds = array<i64: 1>, scalar_prefetch = 0 : i64, scratch_operands = 0 : i64, tpu.core_type = #tpu.core_type<tc>, window_params = [{transform_indices = @transform_0, window_bounds = array<i64: 16, 128>}, {pipeline_mode = #tpu.pipeline_mode<synchronous>, transform_indices = @transform_1, window_bounds = array<i64: 128, 256>}, {pipeline_mode = #tpu.pipeline_mode<synchronous>, transform_indices = @transform_2, window_bounds = array<i64: 1, 256>}, {pipeline_mode = #tpu.pipeline_mode<synchronous>, transform_indices = @transform_3, window_bounds = array<i64: 128, 128>}, {pipeline_mode = #tpu.pipeline_mode<synchronous>, transform_indices = @transform_4, window_bounds = array<i64: 1, 128>}, {pipeline_mode = #tpu.pipeline_mode<synchronous>, transform_indices = @transform_5, window_bounds = array<i64: 128, 128>}, {pipeline_mode = #tpu.pipeline_mode<synchronous>, transform_indices = @transform_6, window_bounds = array<i64: 1, 128>}, {transform_indices = @transform_7, window_bounds = array<i64: 16, 128>}]} {
    %c0 = arith.constant 0 : index
    %c0_0 = arith.constant 0 : index
    %0 = vector.load %arg1[%c0, %c0_0] : memref<16x128xf32, #tpu.memory_space<vmem>>, vector<16x128xf32>
    %c0_1 = arith.constant 0 : index
    %c0_2 = arith.constant 0 : index
    %1 = vector.load %arg2[%c0_1, %c0_2] : memref<128x256xf32, #tpu.memory_space<vmem>>, vector<128x256xf32>
    %cst = arith.constant dense<0.000000e+00> : vector<16x256xf32>
    %2 = tpu.matmul %0, %1, %cst {dimension_numbers = #tpu.dot_dimension_numbers<[1], [0], [0], [1], [0, 0, 1, 1], [], []>} : vector<16x128xf32>, vector<128x256xf32>, vector<16x256xf32> -> vector<16x256xf32>
    %c0_3 = arith.constant 0 : index
    %c0_4 = arith.constant 0 : index
    %3 = vector.load %arg3[%c0_3, %c0_4] : memref<1x256xf32, #tpu.memory_space<vmem>>, vector<1x256xf32>
    %4 = vector.broadcast %3 : vector<1x256xf32> to vector<16x256xf32>
    %5 = arith.addf %2, %4 : vector<16x256xf32>
    %6 = vector.extract_strided_slice %5 {offsets = [0, 0], sizes = [16, 128], strides = [1, 1]} : vector<16x256xf32> to vector<16x128xf32>
    %7 = vector.extract_strided_slice %5 {offsets = [0, 128], sizes = [16, 128], strides = [1, 1]} : vector<16x256xf32> to vector<16x128xf32>
    %c0_5 = arith.constant 0 : index
    %c0_6 = arith.constant 0 : index
    %8 = vector.load %arg4[%c0_5, %c0_6] : memref<128x128xf32, #tpu.memory_space<vmem>>, vector<128x128xf32>
    %cst_7 = arith.constant dense<0.000000e+00> : vector<16x128xf32>
    %9 = tpu.matmul %6, %8, %cst_7 {dimension_numbers = #tpu.dot_dimension_numbers<[1], [0], [0], [1], [0, 0, 1, 1], [], []>} : vector<16x128xf32>, vector<128x128xf32>, vector<16x128xf32> -> vector<16x128xf32>
    %c0_8 = arith.constant 0 : index
    %c0_9 = arith.constant 0 : index
    %10 = vector.load %arg5[%c0_8, %c0_9] : memref<1x128xf32, #tpu.memory_space<vmem>>, vector<1x128xf32>
    %11 = vector.broadcast %10 : vector<1x128xf32> to vector<16x128xf32>
    %12 = arith.addf %9, %11 : vector<16x128xf32>
    %c0_10 = arith.constant 0 : index
    %c0_11 = arith.constant 0 : index
    %13 = vector.load %arg6[%c0_10, %c0_11] : memref<128x128xf32, #tpu.memory_space<vmem>>, vector<128x128xf32>
    %cst_12 = arith.constant dense<0.000000e+00> : vector<16x128xf32>
    %14 = tpu.matmul %12, %13, %cst_12 {dimension_numbers = #tpu.dot_dimension_numbers<[1], [0], [0], [1], [0, 0, 1, 1], [], []>} : vector<16x128xf32>, vector<128x128xf32>, vector<16x128xf32> -> vector<16x128xf32>
    %c0_13 = arith.constant 0 : index
    %c0_14 = arith.constant 0 : index
    %15 = vector.load %arg7[%c0_13, %c0_14] : memref<1x128xf32, #tpu.memory_space<vmem>>, vector<1x128xf32>
    %16 = vector.broadcast %15 : vector<1x128xf32> to vector<16x128xf32>
    %17 = arith.addf %14, %16 : vector<16x128xf32>
    %18 = arith.addf %17, %7 : vector<16x128xf32>
    %c0_15 = arith.constant 0 : index
    %c0_16 = arith.constant 0 : index
    %19 = vector.load %arg8[%c0_15, %c0_16] : memref<16x128xf32, #tpu.memory_space<vmem>>, vector<16x128xf32>
    tpu.vector_store %arg8[%c0_15, %c0_16], %18 {strides = array<i32>} : memref<16x128xf32, #tpu.memory_space<vmem>>, vector<16x128xf32>,
    return
  }
  func.func @transform_0(%arg0: i32) -> (i32, i32) {
    %c0_i32 = arith.constant 0 : i32
    %c0_i32_0 = arith.constant 0 : i32
    return %arg0, %c0_i32 : i32, i32
  }
  func.func @transform_1(%arg0: i32) -> (i32, i32) {
    %c0_i32 = arith.constant 0 : i32
    %c0_i32_0 = arith.constant 0 : i32
    %c0_i32_1 = arith.constant 0 : i32
    return %c0_i32, %c0_i32_0 : i32, i32
  }
  func.func @transform_2(%arg0: i32) -> (i32, i32) {
    %c0_i32 = arith.constant 0 : i32
    %c0_i32_0 = arith.constant 0 : i32
    %c0_i32_1 = arith.constant 0 : i32
    return %c0_i32, %c0_i32_0 : i32, i32
  }
  func.func @transform_3(%arg0: i32) -> (i32, i32) {
    %c0_i32 = arith.constant 0 : i32
    %c0_i32_0 = arith.constant 0 : i32
    %c0_i32_1 = arith.constant 0 : i32
    return %c0_i32, %c0_i32_0 : i32, i32
  }
  func.func @transform_4(%arg0: i32) -> (i32, i32) {
    %c0_i32 = arith.constant 0 : i32
    %c0_i32_0 = arith.constant 0 : i32
    %c0_i32_1 = arith.constant 0 : i32
    return %c0_i32, %c0_i32_0 : i32, i32
  }
  func.func @transform_5(%arg0: i32) -> (i32, i32) {
    %c0_i32 = arith.constant 0 : i32
    %c0_i32_0 = arith.constant 0 : i32
    %c0_i32_1 = arith.constant 0 : i32
    return %c0_i32, %c0_i32_0 : i32, i32
  }
  func.func @transform_6(%arg0: i32) -> (i32, i32) {
    %c0_i32 = arith.constant 0 : i32
    %c0_i32_0 = arith.constant 0 : i32
    %c0_i32_1 = arith.constant 0 : i32
    return %c0_i32, %c0_i32_0 : i32, i32
  }
  func.func @transform_7(%arg0: i32) -> (i32, i32) {
    %c0_i32 = arith.constant 0 : i32
    %c0_i32_0 = arith.constant 0 : i32
    return %arg0, %c0_i32 : i32, i32
  }
}

</mosaic_0001>

<bundles_post_ra>
// kernel: tpu_custom_call.1
= control target key start
LH: loop header
LB: loop body
LE: loop exit
PB: predicated region body
PF: predicated region fallthrough
CT: control target
= control target key end

     0   :  { %12 = vsyncpa [#allocation3], 0  ;;  %s558_s0 = inlined_call_operand.hbm [shape: f32[16,128], index: 0, kind: input, shape index: {}]   ;;  %s559_s1 = inlined_call_operand.hbm [shape: f32[128,256], index: 1, kind: input, shape index: {}]   ;;  %s560_s2 = inlined_call_operand.hbm [shape: f32[1,256], index: 2, kind: input, shape index: {}]   ;;  %s561_s3 = inlined_call_operand.hbm [shape: f32[128,128], index: 3, kind: input, shape index: {}]   ;;  %s562_s4 = inlined_call_operand.vmem [shape: f32[1,128], index: 4, kind: input, shape index: {}]   ;;  %s563_s5 = inlined_call_operand.hbm [shape: f32[128,128], index: 5, kind: input, shape index: {}]   ;;  %s564_s6 = inlined_call_operand.vmem [shape: f32[1,128], index: 6, kind: input, shape index: {}]   ;;  %s565_s7 = inlined_call_operand.hbm [shape: f32[16,128], index: 7, kind: output, shape index: {}]  }
   0x1   :  { %13 = vsyncpa [#allocation6], 0 }
   0x2   :  { %14 = vsyncpa [#allocation9], 0  ;;  %s33_s26 = sshll.u32 %s559_s1, 4  ;;  %s34_s26 = int_to_ptr.hbm [resolvable:$true] %s33_s26 }
   0x3   :  { %15 = vsyncpa [#allocation4], 0  ;;  %s464_s27 = smov [#allocation5]   ;;  %s465_s29 = smov 256  }
   0x4   :  { %s35_s28 = sshll.u32 %s464_s27, 4  ;;  %s466_s30 = smov 16   ;;  %s36_s28 = int_to_ptr.vmem [resolvable:$true] %s35_s28 }
   0x5   :  { %41 = dma.hbm_to_vmem [thread:$0]  %s34_s26, 4096, %s36_s28, [#allocation6], %s465_s29, %s465_s29, %s466_s30  }
   0x6   :  { %s57_s10 = sshll.u32 %s561_s3, 4  ;;  %s467_s11 = smov [#allocation8]   ;;  %s58_s10 = int_to_ptr.hbm [resolvable:$true] %s57_s10 }
   0x7   :  { %s59_s12 = sshll.u32 %s467_s11, 4  ;;  %s20_s15 = sshll.u32 %s558_s0, 4  ;;  %s60_s12 = int_to_ptr.vmem [resolvable:$true] %s59_s12  ;;  %s21_s15 = int_to_ptr.hbm [resolvable:$true] %s20_s15 }
   0x8   :  { %s468_s1 = smov 128   ;;  %s469_s16 = smov 8  }
   0x9   :  { %65 = dma.hbm_to_vmem [thread:$0]  %s58_s10, 2048, %s60_s12, [#allocation9], %s468_s1, %s468_s1, %s469_s16  }
   0xa   :  { %s47_s19 = sshll.u32 %s560_s2, 4  ;;  %s470_s3 = smov [#allocation2]   ;;  %s48_s19 = int_to_ptr.hbm [resolvable:$true] %s47_s19 }
   0xb   :  { %s22_s20 = sshll.u32 %s470_s3, 4  ;;  %s471_s0 = smov [#allocation7]   ;;  %s23_s20 = int_to_ptr.vmem [resolvable:$true] %s22_s20 }
   0xc   :  { %28 = dma.hbm_to_vmem [thread:$0]  %s21_s15, 256, %s23_s20, [#allocation3], %s468_s1, %s468_s1, %s469_s16  }
   0xd   :  { %s49_s21 = sshll.u32 %s471_s0, 4  ;;  %s72_s24 = sshll.u32 %s563_s5, 4  ;;  %s50_s21 = int_to_ptr.vmem [resolvable:$true] %s49_s21  ;;  %s73_s24 = int_to_ptr.hbm [resolvable:$true] %s72_s24 }
   0xe   :  { %52 = dma.hbm_to_vmem [thread:$0]  %s48_s19, 32, %s50_s21, [#allocation6]  }
   0xf   :  { %s472_s25 = smov [#allocation10]  }
  0x10   :  { %s74_s26 = sshll.u32 %s472_s25, 4  ;;  %s75_s26 = int_to_ptr.vmem [resolvable:$true] %s74_s26 }
  0x11   :  { %80 = dma.hbm_to_vmem [thread:$0]  %s73_s24, 2048, %s75_s26, [#allocation9], %s468_s1, %s468_s1, %s469_s16  }
  0x12   :  { %456 = dma.done.wait [#allocation3], 256  }
  0x13   :  { %457 = vsyncadd [#allocation3], 4294967040 }
  0x14   :  { %458 = dma.done.wait [#allocation6], 4128  }
  0x15   :  { %459 = vsyncadd [#allocation6], 4294963168 }
  0x16   :  { %460 = dma.done.wait [#allocation9], 4096  }
  0x17   :  { %461 = vsyncadd [#allocation9], 4294963200  ;;  %v135_v0 = vld [vmem:[#allocation5 + $0xf0] sm:$0xff]  ;;  %v133_v1 = vld [vmem:[#allocation5 + $0xe0] sm:$0xff]  ;;  %s285_s9 = sshll.u32 %s565_s7, 4  ;;  %s286_s9 = int_to_ptr.hbm [resolvable:$true] %s285_s9 }
  0x18   :  { %143 = vmatpush.msra.mxu0 %v135_v0  ;;  %v131_v2 = vld [vmem:[#allocation5 + $0xd0] sm:$0xff]  ;;  %v129_v3 = vld [vmem:[#allocation5 + $0xc0] sm:$0xff]  ;;  %v541_v31 = vld [vmem:[#allocation2 + $0x8] sm:$0xff] }
  0x19   :  { %v127_v4 = vld [vmem:[#allocation5 + $0xb0] sm:$0xff]  ;;  %v125_v5 = vld [vmem:[#allocation5 + $0xa0] sm:$0xff]  ;;  %v136_v36 = vld [vmem:[#allocation5 + $0xf8] sm:$0xff] }
  0x1a   :  { %144 = vmatpush.msra.mxu0 %v133_v1  ;;  %v204_v6 = vld [vmem:[#allocation8 + $0x78] sm:$0xff]  ;;  %v203_v7 = vld [vmem:[#allocation8 + $0x70] sm:$0xff]  ;;  %v202_v9 = vld [vmem:[#allocation8 + $0x68] sm:$0xff]  ;;  %166 = vmatpush.msra.mxu1 %v136_v36 }
  0x1b   :  { %209 = vmatpush.msra.mxu2 %v204_v6  ;;  %v123_v8 = vld [vmem:[#allocation5 + $0x90] sm:$0xff]  ;;  %v121_v10 = vld [vmem:[#allocation5 + $0x80] sm:$0xff]  ;;  %v134_v37 = vld [vmem:[#allocation5 + $0xe8] sm:$0xff] }
  0x1c   :  { %145 = vmatpush.msra.mxu0 %v131_v2  ;;  %v201_v11 = vld [vmem:[#allocation8 + $0x60] sm:$0xff]  ;;  %v119_v12 = vld [vmem:[#allocation5 + $0x70] sm:$0xff]  ;;  %v200_v13 = vld [vmem:[#allocation8 + $0x58] sm:$0xff]  ;;  %167 = vmatpush.msra.mxu1 %v134_v37 }
  0x1d   :  { %210 = vmatpush.msra.mxu2 %v203_v7  ;;  %v117_v14 = vld [vmem:[#allocation5 + $0x60] sm:$0xff]  ;;  %v199_v15 = vld [vmem:[#allocation8 + $0x50] sm:$0xff]  ;;  %v198_v17 = vld [vmem:[#allocation8 + $0x48] sm:$0xff] }
  0x1e   :  { %146 = vmatpush.msra.mxu0 %v129_v3  ;;  %v115_v16 = vld [vmem:[#allocation5 + $0x50] sm:$0xff]  ;;  %v113_v18 = vld [vmem:[#allocation5 + $0x40] sm:$0xff]  ;;  %v132_v39 = vld [vmem:[#allocation5 + $0xd8] sm:$0xff] }
  0x1f   :  { %211 = vmatpush.msra.mxu2 %v202_v9  ;;  %v197_v19 = vld [vmem:[#allocation8 + $0x40] sm:$0xff]  ;;  %v111_v20 = vld [vmem:[#allocation5 + $0x30] sm:$0xff]  ;;  %v196_v21 = vld [vmem:[#allocation8 + $0x38] sm:$0xff]  ;;  %168 = vmatpush.msra.mxu1 %v132_v39 }
  0x20   :  { %147 = vmatpush.msra.mxu0 %v127_v4  ;;  %v109_v22 = vld [vmem:[#allocation5 + $0x20] sm:$0xff]  ;;  %v195_v23 = vld [vmem:[#allocation8 + $0x30] sm:$0xff]  ;;  %v194_v25 = vld [vmem:[#allocation8 + $0x28] sm:$0xff] }
  0x21   :  { %212 = vmatpush.msra.mxu2 %v201_v11  ;;  %v107_v24 = vld [vmem:[#allocation5 + $0x10] sm:$0xff]  ;;  %v105_v26 = vld [vmem:[#allocation5] sm:$0xff]  ;;  %v130_v41 = vld [vmem:[#allocation5 + $0xc8] sm:$0xff] }
  0x22   :  { %148 = vmatpush.msra.mxu0 %v125_v5  ;;  %v193_v27 = vld [vmem:[#allocation8 + $0x20] sm:$0xff]  ;;  %v538_v28 = vld [vmem:[#allocation2] sm:$0xff]  ;;  %v192_v29 = vld [vmem:[#allocation8 + $0x18] sm:$0xff]  ;;  %169 = vmatpush.msra.mxu1 %v130_v41 }
  0x23   :  { %213 = vmatpush.msra.mxu2 %v200_v13  ;;  %v191_v30 = vld [vmem:[#allocation8 + $0x10] sm:$0xff]  ;;  %v190_v32 = vld [vmem:[#allocation8 + $0x8] sm:$0xff]  ;;  %v189_v33 = vld [vmem:[#allocation8] sm:$0xff] }
  0x24   :  { %149 = vmatpush.msra.mxu0 %v123_v8  ;;  %v247_v34 = vld [vmem:[#allocation10 + $0x78] sm:$0xff]  ;;  %v246_v35 = vld [vmem:[#allocation10 + $0x70] sm:$0xff]  ;;  %v245_v38 = vld [vmem:[#allocation10 + $0x68] sm:$0xff] }
  0x25   :  { %214 = vmatpush.msra.mxu2 %v199_v15  ;;  %252 = vmatpush.msra.mxu3 %v247_v34  ;;  %v244_v40 = vld [vmem:[#allocation10 + $0x60] sm:$0xff]  ;;  %v243_v42 = vld [vmem:[#allocation10 + $0x58] sm:$0xff]  ;;  %v242_v44 = vld [vmem:[#allocation10 + $0x50] sm:$0xff] }
  0x26   :  { %150 = vmatpush.msra.mxu0 %v121_v10  ;;  %v128_v43 = vld [vmem:[#allocation5 + $0xb8] sm:$0xff]  ;;  %v126_v45 = vld [vmem:[#allocation5 + $0xa8] sm:$0xff]  ;;  %v137_v51 = vld [vmem:[#allocation7] sm:$0x3] }
  0x27   :  { %215 = vmatpush.msra.mxu2 %v198_v17  ;;  %253 = vmatpush.msra.mxu3 %v246_v35  ;;  %v241_v46 = vld [vmem:[#allocation10 + $0x48] sm:$0xff]  ;;  %v124_v47 = vld [vmem:[#allocation5 + $0x98] sm:$0xff]  ;;  %v240_v48 = vld [vmem:[#allocation10 + $0x40] sm:$0xff]  ;;  %v139_v55 = vperm.slane %v137_v51, 0 }
  0x28   :  { %151 = vmatpush.msra.mxu0 %v119_v12  ;;  %170 = vmatpush.msra.mxu1 %v128_v43  ;;  %v122_v49 = vld [vmem:[#allocation5 + $0x88] sm:$0xff]  ;;  %v239_v50 = vld [vmem:[#allocation10 + $0x38] sm:$0xff]  ;;  %v238_v53 = vld [vmem:[#allocation10 + $0x30] sm:$0xff] }
  0x29   :  { %216 = vmatpush.msra.mxu2 %v197_v19  ;;  %254 = vmatpush.msra.mxu3 %v245_v38  ;;  %v120_v52 = vld [vmem:[#allocation5 + $0x78] sm:$0xff]  ;;  %v118_v54 = vld [vmem:[#allocation5 + $0x68] sm:$0xff]  ;;  %v310_v8 = vld [vmem:[%s562_s4] ss:$0 sm:$0xff]  ;;  %s473_s4 = smov [#allocation11]  }
  0x2a   :  { %152 = vmatpush.msra.mxu0 %v117_v14  ;;  %171 = vmatpush.msra.mxu1 %v126_v45  ;;  %v237_v56 = vld [vmem:[#allocation10 + $0x28] sm:$0xff]  ;;  %v116_v57 = vld [vmem:[#allocation5 + $0x58] sm:$0xff]  ;;  %v236_v58 = vld [vmem:[#allocation10 + $0x20] sm:$0xff]  ;;  %v140_v14 = vperm.slane %v137_v51, 1  ;;  %s283_s29 = sshll.u32 %s473_s4, 4  ;;  %s284_s29 = int_to_ptr.vmem [resolvable:$true] %s283_s29 }
  0x2b   :  { %217 = vmatpush.msra.mxu2 %v196_v21  ;;  %255 = vmatpush.msra.mxu3 %v244_v40  ;;  %v114_v60 = vld [vmem:[#allocation5 + $0x48] sm:$0xff]  ;;  %v235_v62 = vld [vmem:[#allocation10 + $0x18] sm:$0xff]  ;;  %v234_v63 = vld [vmem:[#allocation10 + $0x10] sm:$0xff] }
  0x2c   :  { %153 = vmatpush.msra.mxu0 %v115_v16  ;;  %172 = vmatpush.msra.mxu1 %v124_v47  ;;  %v233_v2 = vld [vmem:[#allocation10 + $0x8] sm:$0xff]  ;;  %v112_v3 = vld [vmem:[#allocation5 + $0x38] sm:$0xff]  ;;  %v232_v4 = vld [vmem:[#allocation10] sm:$0xff] }
  0x2d   :  { %218 = vmatpush.msra.mxu2 %v195_v23  ;;  %256 = vmatpush.msra.mxu3 %v243_v42  ;;  %v110_v5 = vld [vmem:[#allocation5 + $0x28] sm:$0xff]  ;;  %v108_v6 = vld [vmem:[#allocation5 + $0x18] sm:$0xff]  ;;  %v311_v15 = vld [vmem:[%s564_s6] ss:$0 sm:$0xff] }
  0x2e   :  { %154 = vmatpush.msra.mxu0 %v113_v18  ;;  %173 = vmatpush.msra.mxu1 %v122_v49  ;;  %v106_v7 = vld [vmem:[#allocation5 + $0x8] sm:$0xff] }
  0x2f   :  { %219 = vmatpush.msra.mxu2 %v194_v25  ;;  %257 = vmatpush.msra.mxu3 %v242_v44 }
  0x30   :  { %155 = vmatpush.msra.mxu0 %v111_v20  ;;  %174 = vmatpush.msra.mxu1 %v120_v52 }
  0x31   :  { %220 = vmatpush.msra.mxu2 %v193_v27  ;;  %258 = vmatpush.msra.mxu3 %v241_v46 }
  0x32   :  { %156 = vmatpush.msra.mxu0 %v109_v22  ;;  %175 = vmatpush.msra.mxu1 %v118_v54 }
  0x33   :  { %221 = vmatpush.msra.mxu2 %v192_v29  ;;  %259 = vmatpush.msra.mxu3 %v240_v48 }
  0x34   :  { %157 = vmatpush.msra.mxu0 %v107_v24  ;;  %176 = vmatpush.msra.mxu1 %v116_v57 }
  0x35   :  { %222 = vmatpush.msra.mxu2 %v191_v30  ;;  %260 = vmatpush.msra.mxu3 %v239_v50 }
  0x36   :  { %158 = vmatpush.msra.mxu0 %v105_v26  ;;  %177 = vmatpush.msra.mxu1 %v114_v60 }
  0x37   :  { %159 = vmatmul.f32.vlgmr.msra.gmra.mxu0 %v538_v28  ;;  %223 = vmatpush.msra.mxu2 %v190_v32 }
  0x38   :  { %261 = vmatpush.msra.mxu3 %v238_v53  ;;  %178 = vmatpush.msra.mxu1 %v112_v3 }
  0x39   :  { %224 = vmatpush.msra.mxu2 %v189_v33 }
  0x3a   :  { %262 = vmatpush.msra.mxu3 %v237_v56  ;;  %179 = vmatpush.msra.mxu1 %v110_v5 }
  0x3c   :  { %263 = vmatpush.msra.mxu3 %v236_v58  ;;  %180 = vmatpush.msra.mxu1 %v108_v6 }
  0x3e   :  { %264 = vmatpush.msra.mxu3 %v235_v62  ;;  %181 = vmatpush.msra.mxu1 %v106_v7 }
  0x3f   :  { %162 = vmatmul.f32.gmra.mxu0 %v541_v31  ;;  %182 = vmatmul.f32.vlgmr.msra.gmra.mxu1 %v538_v28 }
  0x40   :  { %265 = vmatpush.msra.mxu3 %v234_v63 }
  0x42   :  { %266 = vmatpush.msra.mxu3 %v233_v2 }
  0x44   :  { %267 = vmatpush.msra.mxu3 %v232_v4 }
  0x47   :  { %185 = vmatmul.f32.gmra.mxu1 %v541_v31 }
  0xb4   :  { %v160_v59 = vpop.f32.mrf.mxu0 }
  0xb5   :  { %v161_v61 = vadd.f32 %v160_v59, %v139_v55 }
  0xb7   :  { %225 = vmatmul.f32.vlgmr.msra.gmra.mxu2 %v161_v61 }
  0xbc   :  { %v163_v0 = vpop.f32.mrf.mxu0  ;;  %v183_v13 = vpop.f32.mrf.mxu1 }
  0xbd   :  { %v164_v1 = vadd.f32 %v163_v0, %v139_v55  ;;  %v184_v16 = vadd.f32 %v183_v13, %v140_v14 }
  0xbf   :  { %228 = vmatmul.f32.gmra.mxu2 %v164_v1 }
  0xc4   :  { %v186_v20 = vpop.f32.mrf.mxu1 }
  0xc5   :  { %v187_v21 = vadd.f32 %v186_v20, %v140_v14 }
 0x13a   :  { %v226_v9 = vpop.f32.mrf.mxu2 }
 0x13b   :  { %v227_v10 = vadd.f32 %v310_v8, %v226_v9 }
 0x13d   :  { %268 = vmatmul.f32.vlgmr.msra.gmra.mxu3 %v227_v10 }
 0x142   :  { %v229_v11 = vpop.f32.mrf.mxu2 }
 0x143   :  { %v230_v12 = vadd.f32 %v310_v8, %v229_v11 }
 0x145   :  { %271 = vmatmul.f32.gmra.mxu3 %v230_v12 }
 0x1c0   :  { %v269_v17 = vpop.f32.mrf.mxu3 }
 0x1c1   :  { %v270_v18 = vadd.f32 %v311_v15, %v269_v17 }
 0x1c3   :  { %v275_v19 = vadd.f32 %v270_v18, %v184_v16 }
 0x1c5   :  { %277 = vst [vmem:[#allocation11] sm:$0xff] %v275_v19 }
 0x1c8   :  { %v272_v22 = vpop.f32.mrf.mxu3 }
 0x1c9   :  { %v273_v23 = vadd.f32 %v311_v15, %v272_v22 }
 0x1cb   :  { %v276_v24 = vadd.f32 %v273_v23, %v187_v21 }
 0x1cd   :  { %278 = vst [vmem:[#allocation11 + $0x8] sm:$0xff] %v276_v24 }
 0x1ce   :  { %291 = dma.vmem_to_hbm [thread:$0]  %s284_s29, 256, %s286_s9, [#allocation4], %s468_s1, %s468_s1, %s469_s16  }
 0x1cf   :  { %462 = dma.done.wait [#allocation4], 256  }
 0x1d0   :  { %463 = vsyncadd [#allocation4], 4294967040 }
 0x1d1   :  { %296 = vsyncpa [#allocation3], 1 }
 0x1d2   :  { %297 = vsyncpa [#allocation6], 1 }
 0x1d3   :  { %298 = vsyncpa [#allocation9], 1 }
 0x1d4   :  { %299 = vsyncpa [#allocation4], 1 }

// kernel: tpu_custom_call.1
= control target key start
LH: loop header
LB: loop body
LE: loop exit
PB: predicated region body
PF: predicated region fallthrough
CT: control target
= control target key end

     0   :  { %12 = vsyncpa [#allocation3], 0  ;;  %s558_s0 = inlined_call_operand.hbm [shape: f32[16,128], index: 0, kind: input, shape index: {}]   ;;  %s559_s1 = inlined_call_operand.hbm [shape: f32[128,256], index: 1, kind: input, shape index: {}]   ;;  %s560_s2 = inlined_call_operand.hbm [shape: f32[1,256], index: 2, kind: input, shape index: {}]   ;;  %s561_s3 = inlined_call_operand.hbm [shape: f32[128,128], index: 3, kind: input, shape index: {}]   ;;  %s562_s4 = inlined_call_operand.vmem [shape: f32[1,128], index: 4, kind: input, shape index: {}]   ;;  %s563_s5 = inlined_call_operand.hbm [shape: f32[128,128], index: 5, kind: input, shape index: {}]   ;;  %s564_s6 = inlined_call_operand.vmem [shape: f32[1,128], index: 6, kind: input, shape index: {}]   ;;  %s565_s7 = inlined_call_operand.hbm [shape: f32[16,128], index: 7, kind: output, shape index: {}]  }
   0x1   :  { %13 = vsyncpa [#allocation6], 0 }
   0x2   :  { %14 = vsyncpa [#allocation9], 0  ;;  %s33_s26 = sshll.u32 %s559_s1, 4  ;;  %s34_s26 = int_to_ptr.hbm [resolvable:$true] %s33_s26 }
   0x3   :  { %15 = vsyncpa [#allocation4], 0  ;;  %s464_s27 = smov [#allocation5]   ;;  %s465_s29 = smov 256  }
   0x4   :  { %s35_s28 = sshll.u32 %s464_s27, 4  ;;  %s466_s30 = smov 16   ;;  %s36_s28 = int_to_ptr.vmem [resolvable:$true] %s35_s28 }
   0x5   :  { %41 = dma.hbm_to_vmem [thread:$0]  %s34_s26, 4096, %s36_s28, [#allocation6], %s465_s29, %s465_s29, %s466_s30  }
   0x6   :  { %s57_s10 = sshll.u32 %s561_s3, 4  ;;  %s467_s11 = smov [#allocation8]   ;;  %s58_s10 = int_to_ptr.hbm [resolvable:$true] %s57_s10 }
   0x7   :  { %s59_s12 = sshll.u32 %s467_s11, 4  ;;  %s20_s15 = sshll.u32 %s558_s0, 4  ;;  %s60_s12 = int_to_ptr.vmem [resolvable:$true] %s59_s12  ;;  %s21_s15 = int_to_ptr.hbm [resolvable:$true] %s20_s15 }
   0x8   :  { %s468_s1 = smov 128   ;;  %s469_s16 = smov 8  }
   0x9   :  { %65 = dma.hbm_to_vmem [thread:$0]  %s58_s10, 2048, %s60_s12, [#allocation9], %s468_s1, %s468_s1, %s469_s16  }
   0xa   :  { %s47_s19 = sshll.u32 %s560_s2, 4  ;;  %s470_s3 = smov [#allocation2]   ;;  %s48_s19 = int_to_ptr.hbm [resolvable:$true] %s47_s19 }
   0xb   :  { %s22_s20 = sshll.u32 %s470_s3, 4  ;;  %s471_s0 = smov [#allocation7]   ;;  %s23_s20 = int_to_ptr.vmem [resolvable:$true] %s22_s20 }
   0xc   :  { %28 = dma.hbm_to_vmem [thread:$0]  %s21_s15, 256, %s23_s20, [#allocation3], %s468_s1, %s468_s1, %s469_s16  }
   0xd   :  { %s49_s21 = sshll.u32 %s471_s0, 4  ;;  %s72_s24 = sshll.u32 %s563_s5, 4  ;;  %s50_s21 = int_to_ptr.vmem [resolvable:$true] %s49_s21  ;;  %s73_s24 = int_to_ptr.hbm [resolvable:$true] %s72_s24 }
   0xe   :  { %52 = dma.hbm_to_vmem [thread:$0]  %s48_s19, 32, %s50_s21, [#allocation6]  }
   0xf   :  { %s472_s25 = smov [#allocation10]  }
  0x10   :  { %s74_s26 = sshll.u32 %s472_s25, 4  ;;  %s75_s26 = int_to_ptr.vmem [resolvable:$true] %s74_s26 }
  0x11   :  { %80 = dma.hbm_to_vmem [thread:$0]  %s73_s24, 2048, %s75_s26, [#allocation9], %s468_s1, %s468_s1, %s469_s16  }
  0x12   :  { %456 = dma.done.wait [#allocation3], 256  }
  0x13   :  { %457 = vsyncadd [#allocation3], 4294967040 }
  0x14   :  { %458 = dma.done.wait [#allocation6], 4128  }
  0x15   :  { %459 = vsyncadd [#allocation6], 4294963168 }
  0x16   :  { %460 = dma.done.wait [#allocation9], 4096  }
  0x17   :  { %461 = vsyncadd [#allocation9], 4294963200  ;;  %v135_v0 = vld [vmem:[#allocation5 + $0xf0] sm:$0xff]  ;;  %v133_v1 = vld [vmem:[#allocation5 + $0xe0] sm:$0xff]  ;;  %s285_s9 = sshll.u32 %s565_s7, 4  ;;  %s286_s9 = int_to_ptr.hbm [resolvable:$true] %s285_s9 }
  0x18   :  { %143 = vmatpush.msra.mxu0 %v135_v0  ;;  %v131_v2 = vld [vmem:[#allocation5 + $0xd0] sm:$0xff]  ;;  %v129_v3 = vld [vmem:[#allocation5 + $0xc0] sm:$0xff]  ;;  %v541_v31 = vld [vmem:[#allocation2 + $0x8] sm:$0xff] }
  0x19   :  { %v127_v4 = vld [vmem:[#allocation5 + $0xb0] sm:$0xff]  ;;  %v125_v5 = vld [vmem:[#allocation5 + $0xa0] sm:$0xff]  ;;  %v136_v36 = vld [vmem:[#allocation5 + $0xf8] sm:$0xff] }
  0x1a   :  { %144 = vmatpush.msra.mxu0 %v133_v1  ;;  %v204_v6 = vld [vmem:[#allocation8 + $0x78] sm:$0xff]  ;;  %v203_v7 = vld [vmem:[#allocation8 + $0x70] sm:$0xff]  ;;  %v202_v9 = vld [vmem:[#allocation8 + $0x68] sm:$0xff]  ;;  %166 = vmatpush.msra.mxu1 %v136_v36 }
  0x1b   :  { %209 = vmatpush.msra.mxu2 %v204_v6  ;;  %v123_v8 = vld [vmem:[#allocation5 + $0x90] sm:$0xff]  ;;  %v121_v10 = vld [vmem:[#allocation5 + $0x80] sm:$0xff]  ;;  %v134_v37 = vld [vmem:[#allocation5 + $0xe8] sm:$0xff] }
  0x1c   :  { %145 = vmatpush.msra.mxu0 %v131_v2  ;;  %v201_v11 = vld [vmem:[#allocation8 + $0x60] sm:$0xff]  ;;  %v119_v12 = vld [vmem:[#allocation5 + $0x70] sm:$0xff]  ;;  %v200_v13 = vld [vmem:[#allocation8 + $0x58] sm:$0xff]  ;;  %167 = vmatpush.msra.mxu1 %v134_v37 }
  0x1d   :  { %210 = vmatpush.msra.mxu2 %v203_v7  ;;  %v117_v14 = vld [vmem:[#allocation5 + $0x60] sm:$0xff]  ;;  %v199_v15 = vld [vmem:[#allocation8 + $0x50] sm:$0xff]  ;;  %v198_v17 = vld [vmem:[#allocation8 + $0x48] sm:$0xff] }
  0x1e   :  { %146 = vmatpush.msra.mxu0 %v129_v3  ;;  %v115_v16 = vld [vmem:[#allocation5 + $0x50] sm:$0xff]  ;;  %v113_v18 = vld [vmem:[#allocation5 + $0x40] sm:$0xff]  ;;  %v132_v39 = vld [vmem:[#allocation5 + $0xd8] sm:$0xff] }
  0x1f   :  { %211 = vmatpush.msra.mxu2 %v202_v9  ;;  %v197_v19 = vld [vmem:[#allocation8 + $0x40] sm:$0xff]  ;;  %v111_v20 = vld [vmem:[#allocation5 + $0x30] sm:$0xff]  ;;  %v196_v21 = vld [vmem:[#allocation8 + $0x38] sm:$0xff]  ;;  %168 = vmatpush.msra.mxu1 %v132_v39 }
  0x20   :  { %147 = vmatpush.msra.mxu0 %v127_v4  ;;  %v109_v22 = vld [vmem:[#allocation5 + $0x20] sm:$0xff]  ;;  %v195_v23 = vld [vmem:[#allocation8 + $0x30] sm:$0xff]  ;;  %v194_v25 = vld [vmem:[#allocation8 + $0x28] sm:$0xff] }
  0x21   :  { %212 = vmatpush.msra.mxu2 %v201_v11  ;;  %v107_v24 = vld [vmem:[#allocation5 + $0x10] sm:$0xff]  ;;  %v105_v26 = vld [vmem:[#allocation5] sm:$0xff]  ;;  %v130_v41 = vld [vmem:[#allocation5 + $0xc8] sm:$0xff] }
  0x22   :  { %148 = vmatpush.msra.mxu0 %v125_v5  ;;  %v193_v27 = vld [vmem:[#allocation8 + $0x20] sm:$0xff]  ;;  %v538_v28 = vld [vmem:[#allocation2] sm:$0xff]  ;;  %v192_v29 = vld [vmem:[#allocation8 + $0x18] sm:$0xff]  ;;  %169 = vmatpush.msra.mxu1 %v130_v41 }
  0x23   :  { %213 = vmatpush.msra.mxu2 %v200_v13  ;;  %v191_v30 = vld [vmem:[#allocation8 + $0x10] sm:$0xff]  ;;  %v190_v32 = vld [vmem:[#allocation8 + $0x8] sm:$0xff]  ;;  %v189_v33 = vld [vmem:[#allocation8] sm:$0xff] }
  0x24   :  { %149 = vmatpush.msra.mxu0 %v123_v8  ;;  %v247_v34 = vld [vmem:[#allocation10 + $0x78] sm:$0xff]  ;;  %v246_v35 = vld [vmem:[#allocation10 + $0x70] sm:$0xff]  ;;  %v245_v38 = vld [vmem:[#allocation10 + $0x68] sm:$0xff] }
  0x25   :  { %214 = vmatpush.msra.mxu2 %v199_v15  ;;  %252 = vmatpush.msra.mxu3 %v247_v34  ;;  %v244_v40 = vld [vmem:[#allocation10 + $0x60] sm:$0xff]  ;;  %v243_v42 = vld [vmem:[#allocation10 + $0x58] sm:$0xff]  ;;  %v242_v44 = vld [vmem:[#allocation10 + $0x50] sm:$0xff] }
  0x26   :  { %150 = vmatpush.msra.mxu0 %v121_v10  ;;  %v128_v43 = vld [vmem:[#allocation5 + $0xb8] sm:$0xff]  ;;  %v126_v45 = vld [vmem:[#allocation5 + $0xa8] sm:$0xff]  ;;  %v137_v51 = vld [vmem:[#allocation7] sm:$0x3] }
  0x27   :  { %215 = vmatpush.msra.mxu2 %v198_v17  ;;  %253 = vmatpush.msra.mxu3 %v246_v35  ;;  %v241_v46 = vld [vmem:[#allocation10 + $0x48] sm:$0xff]  ;;  %v124_v47 = vld [vmem:[#allocation5 + $0x98] sm:$0xff]  ;;  %v240_v48 = vld [vmem:[#allocation10 + $0x40] sm:$0xff]  ;;  %v139_v55 = vperm.slane %v137_v51, 0 }
  0x28   :  { %151 = vmatpush.msra.mxu0 %v119_v12  ;;  %170 = vmatpush.msra.mxu1 %v128_v43  ;;  %v122_v49 = vld [vmem:[#allocation5 + $0x88] sm:$0xff]  ;;  %v239_v50 = vld [vmem:[#allocation10 + $0x38] sm:$0xff]  ;;  %v238_v53 = vld [vmem:[#allocation10 + $0x30] sm:$0xff] }
  0x29   :  { %216 = vmatpush.msra.mxu2 %v197_v19  ;;  %254 = vmatpush.msra.mxu3 %v245_v38  ;;  %v120_v52 = vld [vmem:[#allocation5 + $0x78] sm:$0xff]  ;;  %v118_v54 = vld [vmem:[#allocation5 + $0x68] sm:$0xff]  ;;  %v310_v8 = vld [vmem:[%s562_s4] ss:$0 sm:$0xff]  ;;  %s473_s4 = smov [#allocation11]  }
  0x2a   :  { %152 = vmatpush.msra.mxu0 %v117_v14  ;;  %171 = vmatpush.msra.mxu1 %v126_v45  ;;  %v237_v56 = vld [vmem:[#allocation10 + $0x28] sm:$0xff]  ;;  %v116_v57 = vld [vmem:[#allocation5 + $0x58] sm:$0xff]  ;;  %v236_v58 = vld [vmem:[#allocation10 + $0x20] sm:$0xff]  ;;  %v140_v14 = vperm.slane %v137_v51, 1  ;;  %s283_s29 = sshll.u32 %s473_s4, 4  ;;  %s284_s29 = int_to_ptr.vmem [resolvable:$true] %s283_s29 }
  0x2b   :  { %217 = vmatpush.msra.mxu2 %v196_v21  ;;  %255 = vmatpush.msra.mxu3 %v244_v40  ;;  %v114_v60 = vld [vmem:[#allocation5 + $0x48] sm:$0xff]  ;;  %v235_v62 = vld [vmem:[#allocation10 + $0x18] sm:$0xff]  ;;  %v234_v63 = vld [vmem:[#allocation10 + $0x10] sm:$0xff] }
  0x2c   :  { %153 = vmatpush.msra.mxu0 %v115_v16  ;;  %172 = vmatpush.msra.mxu1 %v124_v47  ;;  %v233_v2 = vld [vmem:[#allocation10 + $0x8] sm:$0xff]  ;;  %v112_v3 = vld [vmem:[#allocation5 + $0x38] sm:$0xff]  ;;  %v232_v4 = vld [vmem:[#allocation10] sm:$0xff] }
  0x2d   :  { %218 = vmatpush.msra.mxu2 %v195_v23  ;;  %256 = vmatpush.msra.mxu3 %v243_v42  ;;  %v110_v5 = vld [vmem:[#allocation5 + $0x28] sm:$0xff]  ;;  %v108_v6 = vld [vmem:[#allocation5 + $0x18] sm:$0xff]  ;;  %v311_v15 = vld [vmem:[%s564_s6] ss:$0 sm:$0xff] }
  0x2e   :  { %154 = vmatpush.msra.mxu0 %v113_v18  ;;  %173 = vmatpush.msra.mxu1 %v122_v49  ;;  %v106_v7 = vld [vmem:[#allocation5 + $0x8] sm:$0xff] }
  0x2f   :  { %219 = vmatpush.msra.mxu2 %v194_v25  ;;  %257 = vmatpush.msra.mxu3 %v242_v44 }
  0x30   :  { %155 = vmatpush.msra.mxu0 %v111_v20  ;;  %174 = vmatpush.msra.mxu1 %v120_v52 }
  0x31   :  { %220 = vmatpush.msra.mxu2 %v193_v27  ;;  %258 = vmatpush.msra.mxu3 %v241_v46 }
  0x32   :  { %156 = vmatpush.msra.mxu0 %v109_v22  ;;  %175 = vmatpush.msra.mxu1 %v118_v54 }
  0x33   :  { %221 = vmatpush.msra.mxu2 %v192_v29  ;;  %259 = vmatpush.msra.mxu3 %v240_v48 }
  0x34   :  { %157 = vmatpush.msra.mxu0 %v107_v24  ;;  %176 = vmatpush.msra.mxu1 %v116_v57 }
  0x35   :  { %222 = vmatpush.msra.mxu2 %v191_v30  ;;  %260 = vmatpush.msra.mxu3 %v239_v50 }
  0x36   :  { %158 = vmatpush.msra.mxu0 %v105_v26  ;;  %177 = vmatpush.msra.mxu1 %v114_v60 }
  0x37   :  { %159 = vmatmul.f32.vlgmr.msra.gmra.mxu0 %v538_v28  ;;  %223 = vmatpush.msra.mxu2 %v190_v32 }
  0x38   :  { %261 = vmatpush.msra.mxu3 %v238_v53  ;;  %178 = vmatpush.msra.mxu1 %v112_v3 }
  0x39   :  { %224 = vmatpush.msra.mxu2 %v189_v33 }
  0x3a   :  { %262 = vmatpush.msra.mxu3 %v237_v56  ;;  %179 = vmatpush.msra.mxu1 %v110_v5 }
  0x3c   :  { %263 = vmatpush.msra.mxu3 %v236_v58  ;;  %180 = vmatpush.msra.mxu1 %v108_v6 }
  0x3e   :  { %264 = vmatpush.msra.mxu3 %v235_v62  ;;  %181 = vmatpush.msra.mxu1 %v106_v7 }
  0x3f   :  { %162 = vmatmul.f32.gmra.mxu0 %v541_v31  ;;  %182 = vmatmul.f32.vlgmr.msra.gmra.mxu1 %v538_v28 }
  0x40   :  { %265 = vmatpush.msra.mxu3 %v234_v63 }
  0x42   :  { %266 = vmatpush.msra.mxu3 %v233_v2 }
  0x44   :  { %267 = vmatpush.msra.mxu3 %v232_v4 }
  0x47   :  { %185 = vmatmul.f32.gmra.mxu1 %v541_v31 }
  0xb4   :  { %v160_v59 = vpop.f32.mrf.mxu0 }
  0xb5   :  { %v161_v61 = vadd.f32 %v160_v59, %v139_v55 }
  0xb7   :  { %225 = vmatmul.f32.vlgmr.msra.gmra.mxu2 %v161_v61 }
  0xbc   :  { %v163_v0 = vpop.f32.mrf.mxu0  ;;  %v183_v13 = vpop.f32.mrf.mxu1 }
  0xbd   :  { %v164_v1 = vadd.f32 %v163_v0, %v139_v55  ;;  %v184_v16 = vadd.f32 %v183_v13, %v140_v14 }
  0xbf   :  { %228 = vmatmul.f32.gmra.mxu2 %v164_v1 }
  0xc4   :  { %v186_v20 = vpop.f32.mrf.mxu1 }
  0xc5   :  { %v187_v21 = vadd.f32 %v186_v20, %v140_v14 }
 0x13a   :  { %v226_v9 = vpop.f32.mrf.mxu2 }
 0x13b   :  { %v227_v10 = vadd.f32 %v310_v8, %v226_v9 }
 0x13d   :  { %268 = vmatmul.f32.vlgmr.msra.gmra.mxu3 %v227_v10 }
 0x142   :  { %v229_v11 = vpop.f32.mrf.mxu2 }
 0x143   :  { %v230_v12 = vadd.f32 %v310_v8, %v229_v11 }
 0x145   :  { %271 = vmatmul.f32.gmra.mxu3 %v230_v12 }
 0x1c0   :  { %v269_v17 = vpop.f32.mrf.mxu3 }
 0x1c1   :  { %v270_v18 = vadd.f32 %v311_v15, %v269_v17 }
 0x1c3   :  { %v275_v19 = vadd.f32 %v270_v18, %v184_v16 }
 0x1c5   :  { %277 = vst [vmem:[#allocation11] sm:$0xff] %v275_v19 }
 0x1c8   :  { %v272_v22 = vpop.f32.mrf.mxu3 }
 0x1c9   :  { %v273_v23 = vadd.f32 %v311_v15, %v272_v22 }
 0x1cb   :  { %v276_v24 = vadd.f32 %v273_v23, %v187_v21 }
 0x1cd   :  { %278 = vst [vmem:[#allocation11 + $0x8] sm:$0xff] %v276_v24 }
 0x1ce   :  { %291 = dma.vmem_to_hbm [thread:$0]  %s284_s29, 256, %s286_s9, [#allocation4], %s468_s1, %s468_s1, %s469_s16  }
 0x1cf   :  { %462 = dma.done.wait [#allocation4], 256  }
 0x1d0   :  { %463 = vsyncadd [#allocation4], 4294967040 }
 0x1d1   :  { %296 = vsyncpa [#allocation3], 1 }
 0x1d2   :  { %297 = vsyncpa [#allocation6], 1 }
 0x1d3   :  { %298 = vsyncpa [#allocation9], 1 }
 0x1d4   :  { %299 = vsyncpa [#allocation4], 1 }

</bundles_post_ra>
